<compile_context>
chip_gen: v7x
topology: tpu7x:2x2x1
jax: 0.10.0
libtpu: 0.0.40
codegen_flags: <defaults>
</compile_context>

<pallas_src>
import jax
import jax.numpy as jnp
from jax import lax
from jax.experimental import pallas as pl
from jax.experimental.pallas import tpu as pltpu


def edge_mlp_kernel(u_ref, g_ref, w1u_ref, w1g_ref, b1_ref, w2_ref, b2_ref, o_ref):
    """One batch tile.

    u_ref, g_ref : (TM, E)  input dtype, native row-major layout (streamed)
    w1u_ref      : (H, E)   compute dtype (grid-resident)
    w1g_ref      : (H, E)   compute dtype (grid-resident)
    b1_ref       : (H, 1)   float32       (grid-resident)
    w2_ref       : (H, O)   float32       (grid-resident, already transposed)
    b2_ref       : (O, 1)   float32       (grid-resident)
    o_ref        : (O, TM)  output dtype, batch on lanes (lane-dense stores)
    """
    dt = w1u_ref.dtype
    # In-kernel transpose to batch-on-lanes (XLU), then cast on lane-dense
    # vregs (cheap VPU).  This replaces the old wrapper-side concat/transpose
    # that cost an extra full HBM pass.
    u_t = u_ref[...].T.astype(dt)          # (E, TM)
    g_t = g_ref[...].T.astype(dt)          # (E, TM)

    h = jnp.dot(w1u_ref[...], u_t, preferred_element_type=jnp.float32)
    h = h + jnp.dot(w1g_ref[...], g_t, preferred_element_type=jnp.float32)
    h = jnp.maximum(h + b1_ref[...], 0.0)  # (H, TM) f32: bias + ReLU in f32

    out_dim = o_ref.shape[0]
    if out_dim == 1:
        # (1, H) @ (H, TM) matvec as VPU multiply + sublane reduction: avoids
        # an MXU weight swap and wasted single-lane matmul passes every step.
        y = jnp.sum(h * w2_ref[...], axis=0, keepdims=True) + b2_ref[...]
    else:
        y = lax.dot_general(w2_ref[...], h, (((0,), (0,)), ((), ())),
                            preferred_element_type=jnp.float32) + b2_ref[...]
    o_ref[...] = y.astype(o_ref.dtype)


def _edge_mlp(user_emb, game_emb, params, *, tile_m=8192,
              compute_dtype=jnp.bfloat16):
    """params (PyTorch-native orientation):
         w1: (H, 2E), b1: (H,), w2: (O, H), b2: (O,)
    Returns (N, O) in the input dtype."""
    N, E = user_emb.shape
    w1, b1, w2, b2 = params["w1"], params["b1"], params["w2"], params["b2"]
    H, in1 = w1.shape
    assert in1 == 2 * E, "w1 must have in_features == 2 * embed_dim"
    O = w2.shape[0]
    out_dtype = user_emb.dtype

    # Lane tile: multiple of 128, no larger than needed for this batch.
    tile_m = max(128, (min(tile_m, pl.cdiv(N, 128) * 128) // 128) * 128)
    grid = (pl.cdiv(N, tile_m),)   # last block may be partial; Pallas clips it

    # Tiny one-time weight prep (fuses under jit): split W1 into user / game
    # halves, cast to the MXU compute dtype, reshape biases/W2 for broadcast.
    w1u = w1[:, :E].astype(compute_dtype)               # (H, E)
    w1g = w1[:, E:].astype(compute_dtype)               # (H, E)
    b1c = b1.reshape(H, 1).astype(jnp.float32)          # (H, 1)
    w2c = w2.T.astype(jnp.float32)                      # (H, O)
    b2c = b2.reshape(O, 1).astype(jnp.float32)          # (O, 1)

    # Conservative (lane-padded) VMEM footprint for the double-buffered batch
    # tiles; cap at 32 MiB so it is valid on v5e/v6e/v7x.
    in_bytes = 2 * 2 * tile_m * 128 * user_emb.dtype.itemsize
    out_bytes = 2 * 8 * tile_m * out_dtype.itemsize
    vmem_limit = int(min(max(in_bytes + out_bytes + (2 << 20), 16 << 20), 32 << 20))

    y_t = pl.pallas_call(
        edge_mlp_kernel,
        out_shape=jax.ShapeDtypeStruct((O, N), out_dtype),
        grid_spec=pltpu.PrefetchScalarGridSpec(
            num_scalar_prefetch=0,
            grid=grid,
            in_specs=[
                pl.BlockSpec((tile_m, E), lambda i: (i, 0)),   # user tile (streamed)
                pl.BlockSpec((tile_m, E), lambda i: (i, 0)),   # game tile (streamed)
                pl.BlockSpec((H, E), lambda i: (0, 0)),        # W1 user half (resident)
                pl.BlockSpec((H, E), lambda i: (0, 0)),        # W1 game half (resident)
                pl.BlockSpec((H, 1), lambda i: (0, 0)),        # b1 (resident)
                pl.BlockSpec((H, O), lambda i: (0, 0)),        # W2^T (resident)
                pl.BlockSpec((O, 1), lambda i: (0, 0)),        # b2 (resident)
            ],
            out_specs=pl.BlockSpec((O, tile_m), lambda i: (0, i)),
        ),
        compiler_params=pltpu.CompilerParams(
            # Independent batch tiles: on v7x megacore this axis shards across
            # both TensorCores whenever grid > 1.
            dimension_semantics=("parallel",),
            vmem_limit_bytes=vmem_limit,
        ),
    )(user_emb, game_emb, w1u, w1g, b1c, w2c, b2c)

    return y_t.T   # (O, N) -> (N, O); trivial under jit since O is tiny


edge_mlp = jax.jit(_edge_mlp, static_argnames=("tile_m", "compute_dtype"))


def init_params(key, embed_dim, hidden_dim=64, out_dim=1):
    """Deterministic synthetic parameters, PyTorch Linear-style uniform init,
    stored in PyTorch-native (out_features, in_features) orientation."""
    k1, k2, k3, k4 = jax.random.split(key, 4)
    in1 = embed_dim * 2
    bound1 = 1.0 / jnp.sqrt(in1)
    bound2 = 1.0 / jnp.sqrt(hidden_dim)
    w1 = jax.random.uniform(k1, (hidden_dim, in1), jnp.float32, -bound1, bound1)
    b1 = jax.random.uniform(k2, (hidden_dim,), jnp.float32, -bound1, bound1)
    w2 = jax.random.uniform(k3, (out_dim, hidden_dim), jnp.float32, -bound2, bound2)
    b2 = jax.random.uniform(k4, (out_dim,), jnp.float32, -bound2, bound2)
    return {"w1": w1, "b1": b1, "w2": w2, "b2": b2}


def edge_mlp_ref(user_emb, game_emb, params):
    x = jnp.concatenate([user_emb, game_emb], axis=-1)
    h = jnp.maximum(x @ params["w1"].T + params["b1"], 0.0)
    return h @ params["w2"].T + params["b2"]


if __name__ == "__main__":
    key = jax.random.PRNGKey(0)
    k_u, k_g, k_p, k_u2, k_g2, k_p2 = jax.random.split(key, 6)

    batch = 8
    embed_dim = 16
    hidden_dim = 32
    out_dim = 1

    user_emb = jax.random.normal(k_u, (batch, embed_dim), jnp.float32)
    game_emb = jax.random.normal(k_g, (batch, embed_dim), jnp.float32)
    params = init_params(k_p, embed_dim, hidden_dim, out_dim)
    ref = edge_mlp_ref(user_emb, game_emb, params)

    # Default path: native-layout inputs, bf16 MXU compute, f32 accumulation.
    out = edge_mlp(user_emb, game_emb, params)
    jax.block_until_ready(out)
    assert out.shape == (batch, out_dim)
    assert jnp.allclose(out, ref, atol=3e-2, rtol=3e-2), "bf16 path mismatch"

    # Multi-tile grid + partial last block (no padding pass anywhere).
    batch2 = 300  # not a multiple of 128 or of the tile
    u2 = jax.random.normal(k_u2, (batch2, embed_dim), jnp.float32)
    g2 = jax.random.normal(k_g2, (batch2, embed_dim), jnp.float32)
    out2 = edge_mlp(u2, g2, params, tile_m=256)
    jax.block_until_ready(out2)
    ref2 = edge_mlp_ref(u2, g2, params)
    assert out2.shape == (batch2, out_dim)
    assert jnp.allclose(out2, ref2, atol=3e-2, rtol=3e-2), "multi-tile path mismatch"

    # out_dim > 1 exercises the dot_general second-layer branch.
    params3 = init_params(k_p2, embed_dim, hidden_dim, out_dim=2)
    out3 = edge_mlp(user_emb, game_emb, params3)
    jax.block_until_ready(out3)
    ref3 = edge_mlp_ref(user_emb, game_emb, params3)
    assert out3.shape == (batch, 2)
    assert jnp.allclose(out3, ref3, atol=3e-2, rtol=3e-2), "out_dim>1 path mismatch"

    print("KERNEL_OK")
</pallas_src>

<mosaic_0001>
module attributes {stable_mosaic.version = 11 : i64} {
  func.func @edge_mlp_kernel(%arg0: i32, %arg1: memref<128x16xf32, #tpu.memory_space<vmem>>, %arg2: memref<128x16xf32, #tpu.memory_space<vmem>>, %arg3: memref<32x16xbf16, #tpu.memory_space<vmem>>, %arg4: memref<32x16xbf16, #tpu.memory_space<vmem>>, %arg5: memref<32x1xf32, #tpu.memory_space<vmem>>, %arg6: memref<32x1xf32, #tpu.memory_space<vmem>>, %arg7: memref<1x1xf32, #tpu.memory_space<vmem>>, %arg8: memref<1x128xf32, #tpu.memory_space<vmem>>) attributes {dimension_semantics = [#tpu.dimension_semantics<parallel>], iteration_bounds = array<i64: 1>, scalar_prefetch = 0 : i64, scratch_operands = 0 : i64, tpu.core_type = #tpu.core_type<tc>, window_params = [{transform_indices = @transform_0, window_bounds = array<i64: 128, 16>}, {transform_indices = @transform_1, window_bounds = array<i64: 128, 16>}, {pipeline_mode = #tpu.pipeline_mode<synchronous>, transform_indices = @transform_2, window_bounds = array<i64: 32, 16>}, {pipeline_mode = #tpu.pipeline_mode<synchronous>, transform_indices = @transform_3, window_bounds = array<i64: 32, 16>}, {pipeline_mode = #tpu.pipeline_mode<synchronous>, transform_indices = @transform_4, window_bounds = array<i64: 32, 1>}, {pipeline_mode = #tpu.pipeline_mode<synchronous>, transform_indices = @transform_5, window_bounds = array<i64: 32, 1>}, {pipeline_mode = #tpu.pipeline_mode<synchronous>, transform_indices = @transform_6, window_bounds = array<i64: 1, 1>}, {transform_indices = @transform_7, window_bounds = array<i64: 1, 128>}]} {
    %c0 = arith.constant 0 : index
    %c0_0 = arith.constant 0 : index
    %0 = vector.load %arg1[%c0, %c0_0] : memref<128x16xf32, #tpu.memory_space<vmem>>, vector<128x16xf32>
    %1 = tpu.transpose %0, [1, 0] : vector<128x16xf32> -> vector<16x128xf32>
    %2 = arith.truncf %1 : vector<16x128xf32> to vector<16x128xbf16>
    %c0_1 = arith.constant 0 : index
    %c0_2 = arith.constant 0 : index
    %3 = vector.load %arg2[%c0_1, %c0_2] : memref<128x16xf32, #tpu.memory_space<vmem>>, vector<128x16xf32>
    %4 = tpu.transpose %3, [1, 0] : vector<128x16xf32> -> vector<16x128xf32>
    %5 = arith.truncf %4 : vector<16x128xf32> to vector<16x128xbf16>
    %c0_3 = arith.constant 0 : index
    %c0_4 = arith.constant 0 : index
    %6 = vector.load %arg3[%c0_3, %c0_4] : memref<32x16xbf16, #tpu.memory_space<vmem>>, vector<32x16xbf16>
    %cst = arith.constant dense<0.000000e+00> : vector<32x128xf32>
    %7 = tpu.matmul %6, %2, %cst {dimension_numbers = #tpu.dot_dimension_numbers<[1], [0], [0], [1], [0, 0, 1, 1], [], []>} : vector<32x16xbf16>, vector<16x128xbf16>, vector<32x128xf32> -> vector<32x128xf32>
    %c0_5 = arith.constant 0 : index
    %c0_6 = arith.constant 0 : index
    %8 = vector.load %arg4[%c0_5, %c0_6] : memref<32x16xbf16, #tpu.memory_space<vmem>>, vector<32x16xbf16>
    %cst_7 = arith.constant dense<0.000000e+00> : vector<32x128xf32>
    %9 = tpu.matmul %8, %5, %cst_7 {dimension_numbers = #tpu.dot_dimension_numbers<[1], [0], [0], [1], [0, 0, 1, 1], [], []>} : vector<32x16xbf16>, vector<16x128xbf16>, vector<32x128xf32> -> vector<32x128xf32>
    %10 = arith.addf %7, %9 : vector<32x128xf32>
    %c0_8 = arith.constant 0 : index
    %c0_9 = arith.constant 0 : index
    %11 = vector.load %arg5[%c0_8, %c0_9] : memref<32x1xf32, #tpu.memory_space<vmem>>, vector<32x1xf32>
    %12 = vector.broadcast %11 : vector<32x1xf32> to vector<32x128xf32>
    %13 = arith.addf %10, %12 : vector<32x128xf32>
    %cst_10 = arith.constant 0.000000e+00 : f32
    %14 = vector.broadcast %cst_10 : f32 to vector<32x128xf32>
    %15 = arith.maximumf %13, %14 : vector<32x128xf32>
    %c0_11 = arith.constant 0 : index
    %c0_12 = arith.constant 0 : index
    %16 = vector.load %arg6[%c0_11, %c0_12] : memref<32x1xf32, #tpu.memory_space<vmem>>, vector<32x1xf32>
    %17 = vector.broadcast %16 : vector<32x1xf32> to vector<32x128xf32>
    %18 = arith.mulf %15, %17 : vector<32x128xf32>
    %cst_13 = arith.constant dense<0.000000e+00> : vector<128xf32>
    %19 = vector.multi_reduction <add>, %18, %cst_13 [0] : vector<32x128xf32> to vector<128xf32>
    %20 = vector.shape_cast %19 : vector<128xf32> to vector<1x128xf32>
    %c0_14 = arith.constant 0 : index
    %c0_15 = arith.constant 0 : index
    %21 = vector.load %arg7[%c0_14, %c0_15] : memref<1x1xf32, #tpu.memory_space<vmem>>, vector<1x1xf32>
    %22 = vector.broadcast %21 : vector<1x1xf32> to vector<1x128xf32>
    %23 = arith.addf %20, %22 : vector<1x128xf32>
    %c0_16 = arith.constant 0 : index
    %c0_17 = arith.constant 0 : index
    %24 = vector.load %arg8[%c0_16, %c0_17] : memref<1x128xf32, #tpu.memory_space<vmem>>, vector<1x128xf32>
    tpu.vector_store %arg8[%c0_16, %c0_17], %23 {strides = array<i32>} : memref<1x128xf32, #tpu.memory_space<vmem>>, vector<1x128xf32>,
    return
  }
  func.func @transform_0(%arg0: i32) -> (i32, i32) {
    %c0_i32 = arith.constant 0 : i32
    %c0_i32_0 = arith.constant 0 : i32
    return %arg0, %c0_i32 : i32, i32
  }
  func.func @transform_1(%arg0: i32) -> (i32, i32) {
    %c0_i32 = arith.constant 0 : i32
    %c0_i32_0 = arith.constant 0 : i32
    return %arg0, %c0_i32 : i32, i32
  }
  func.func @transform_2(%arg0: i32) -> (i32, i32) {
    %c0_i32 = arith.constant 0 : i32
    %c0_i32_0 = arith.constant 0 : i32
    %c0_i32_1 = arith.constant 0 : i32
    return %c0_i32, %c0_i32_0 : i32, i32
  }
  func.func @transform_3(%arg0: i32) -> (i32, i32) {
    %c0_i32 = arith.constant 0 : i32
    %c0_i32_0 = arith.constant 0 : i32
    %c0_i32_1 = arith.constant 0 : i32
    return %c0_i32, %c0_i32_0 : i32, i32
  }
  func.func @transform_4(%arg0: i32) -> (i32, i32) {
    %c0_i32 = arith.constant 0 : i32
    %c0_i32_0 = arith.constant 0 : i32
    %c0_i32_1 = arith.constant 0 : i32
    return %c0_i32, %c0_i32_0 : i32, i32
  }
  func.func @transform_5(%arg0: i32) -> (i32, i32) {
    %c0_i32 = arith.constant 0 : i32
    %c0_i32_0 = arith.constant 0 : i32
    %c0_i32_1 = arith.constant 0 : i32
    return %c0_i32, %c0_i32_0 : i32, i32
  }
  func.func @transform_6(%arg0: i32) -> (i32, i32) {
    %c0_i32 = arith.constant 0 : i32
    %c0_i32_0 = arith.constant 0 : i32
    %c0_i32_1 = arith.constant 0 : i32
    return %c0_i32, %c0_i32_0 : i32, i32
  }
  func.func @transform_7(%arg0: i32) -> (i32, i32) {
    %c0_i32 = arith.constant 0 : i32
    %c0_i32_0 = arith.constant 0 : i32
    return %c0_i32, %arg0 : i32, i32
  }
}

</mosaic_0001>

<bundles_post_ra>
// kernel: _edge_mlp.1
= control target key start
LH: loop header
LB: loop body
LE: loop exit
PB: predicated region body
PF: predicated region fallthrough
CT: control target
= control target key end

     0   :  { %s659_s0 = inlined_call_operand.vmem [shape: f32[8,16], index: 0, kind: input, shape index: {}]   ;;  %s660_s1 = inlined_call_operand.vmem [shape: f32[8,16], index: 1, kind: input, shape index: {}]   ;;  %s661_s2 = inlined_call_operand.vmem [shape: bf16[32,16], index: 2, kind: input, shape index: {}]   ;;  %s662_s3 = inlined_call_operand.vmem [shape: bf16[32,16], index: 3, kind: input, shape index: {}]   ;;  %s663_s4 = inlined_call_operand.vmem [shape: f32[32,1], index: 4, kind: input, shape index: {}]   ;;  %s664_s5 = inlined_call_operand.vmem [shape: f32[32,1], index: 5, kind: input, shape index: {}]   ;;  %s665_s6 = inlined_call_operand.<no memory space> [shape: f32[1,1], index: 6, kind: input, shape index: {}]   ;;  %s666_s7 = inlined_call_operand.hbm [shape: f32[1,8], index: 7, kind: output, shape index: {}]  }
   0x1   :  { %v12_v0 = vstv %s665_s6 }
   0x2   :  { %13 = vst [vmem:[#allocation2] sm:$0x1] %v12_v0 }
   0x3   :  { %v30_v1 = vld [vmem:[%s659_s0] sm:$0xff]  ;;  %v31_v3 = vld [vmem:[%s659_s0 + $0x8] sm:$0xff]  ;;  %v32_v7 = vld [vmem:[%s659_s0 + $0x10] sm:$0xff]  ;;  %vm146_vm0 = vcmask 130048  }
   0x4   :  { %v79_v2 = vld [vmem:[%s660_s1] sm:$0xff]  ;;  %v80_v5 = vld [vmem:[%s660_s1 + $0x8] sm:$0xff]  ;;  %v81_v8 = vld [vmem:[%s660_s1 + $0x10] sm:$0xff] }
   0x5   :  { %v394_v4 = vpack.i.bf16 %v79_v2, %v30_v1  ;;  %v396_v6 = vpack.i.bf16 %v80_v5, %v31_v3  ;;  %v398_v9 = vpack.i.bf16 %v81_v8, %v32_v7  ;;  %v33_v10 = vld [vmem:[%s659_s0 + $0x18] sm:$0xff]  ;;  %v34_v12 = vld [vmem:[%s659_s0 + $0x20] sm:$0xff] }
   0x6   :  { %v82_v11 = vld [vmem:[%s660_s1 + $0x18] sm:$0xff]  ;;  %v83_v14 = vld [vmem:[%s660_s1 + $0x20] sm:$0xff] }
   0x7   :  { %395 = vxpose.xlu0.b32.start [1/16] (narrow) %v394_v4, 16  ;;  %v400_v13 = vpack.i.bf16 %v82_v11, %v33_v10  ;;  %v438_v15 = vld [vmem:[%s662_s3] sm:$0xff]   ;;  %v402_v17 = vpack.i.bf16 %v83_v14, %v34_v12 }
   0x8   :  { %v439_v16 = vld [vmem:[%s661_s2] sm:$0xff]   ;;  %378 = vmatprep.mubr.msk.bf16.mxu1 %vm146_vm0, %v438_v15 }
   0xb   :  { %397 = vxpose.xlu0.b32.cont [2/16] (narrow) %v396_v6, 16 }
   0xf   :  { %399 = vxpose.xlu0.b32.cont [3/16] (narrow) %v398_v9, 16 }
  0x13   :  { %401 = vxpose.xlu0.b32.cont [4/16] (narrow) %v400_v13, 16 }
  0x14   :  { %14 = vsyncpa [#allocation4], 0  ;;  %v35_v18 = vld [vmem:[%s659_s0 + $0x28] sm:$0xff]  ;;  %384 = vmatprep.mubr.msk.bf16.mxu0 %vm146_vm0, %v439_v16  ;;  %v267_v20 = vld [vmem:[%s663_s4] sm:$0xff]  ;;  %v466_v21 = vmov 0  }
  0x15   :  { %v84_v19 = vld [vmem:[%s660_s1 + $0x28] sm:$0xff]  ;;  %436 = vset.pattern.permute.xlu1 %v466_v21  ;;  %v36_v24 = vld [vmem:[%s659_s0 + $0x30] sm:$0xff]  ;;  %v37_v28 = vld [vmem:[%s659_s0 + $0x38] sm:$0xff] }
  0x16   :  { %273 = vperm.xlu1 %436, %v267_v20   ;;  %v404_v22 = vpack.i.bf16 %v84_v19, %v35_v18  ;;  %v268_v23 = vld [vmem:[%s663_s4 + $0x8] sm:$0xff]  ;;  %v85_v25 = vld [vmem:[%s660_s1 + $0x30] sm:$0xff]  ;;  %v86_v29 = vld [vmem:[%s660_s1 + $0x38] sm:$0xff] }
  0x17   :  { %403 = vxpose.xlu0.b32.cont [5/16] (narrow) %v402_v17, 16  ;;  %v406_v26 = vpack.i.bf16 %v85_v25, %v36_v24  ;;  %v269_v27 = vld [vmem:[%s663_s4 + $0x10] sm:$0xff]  ;;  %v408_v30 = vpack.i.bf16 %v86_v29, %v37_v28  ;;  %v270_v31 = vld [vmem:[%s663_s4 + $0x18] sm:$0xff]  ;;  %v38_v32 = vld [vmem:[%s659_s0 + $0x40] sm:$0xff] }
  0x18   :  { %v87_v33 = vld [vmem:[%s660_s1 + $0x40] sm:$0xff]  ;;  %v39_v36 = vld [vmem:[%s659_s0 + $0x48] sm:$0xff]  ;;  %v40_v40 = vld [vmem:[%s659_s0 + $0x50] sm:$0xff] }
  0x19   :  { %v410_v34 = vpack.i.bf16 %v87_v33, %v38_v32  ;;  %v299_v35 = vld [vmem:[%s664_s5] sm:$0xff]  ;;  %v88_v37 = vld [vmem:[%s660_s1 + $0x48] sm:$0xff]  ;;  %v89_v41 = vld [vmem:[%s660_s1 + $0x50] sm:$0xff] }
  0x1a   :  { %278 = vperm.xlu1 %436, %v268_v23   ;;  %v412_v38 = vpack.i.bf16 %v88_v37, %v39_v36  ;;  %v300_v39 = vld [vmem:[%s664_s5 + $0x8] sm:$0xff]  ;;  %v414_v42 = vpack.i.bf16 %v89_v41, %v40_v40  ;;  %v301_v43 = vld [vmem:[%s664_s5 + $0x10] sm:$0xff]  ;;  %v41_v44 = vld [vmem:[%s659_s0 + $0x58] sm:$0xff]  ;;  %v342_v41 = vlaneseq }
  0x1b   :  { %405 = vxpose.xlu0.b32.cont [6/16] (narrow) %v404_v22, 16  ;;  %v90_v45 = vld [vmem:[%s660_s1 + $0x58] sm:$0xff]  ;;  %v42_v48 = vld [vmem:[%s659_s0 + $0x60] sm:$0xff]  ;;  %v43_v52 = vld [vmem:[%s659_s0 + $0x68] sm:$0xff] }
  0x1c   :  { %v416_v46 = vpack.i.bf16 %v90_v45, %v41_v44  ;;  %v302_v47 = vld [vmem:[%s664_s5 + $0x18] sm:$0xff]  ;;  %v91_v49 = vld [vmem:[%s660_s1 + $0x60] sm:$0xff]  ;;  %v92_v53 = vld [vmem:[%s660_s1 + $0x68] sm:$0xff]  ;;  %v343_v44 = vshrl.u32 %v342_v41, 7 }
  0x1d   :  { %v418_v50 = vpack.i.bf16 %v91_v49, %v42_v48  ;;  %v336_v51 = vld [vmem:[#allocation2] sm:$0x1]  ;;  %v420_v54 = vpack.i.bf16 %v92_v53, %v43_v52  ;;  %v44_v55 = vld [vmem:[%s659_s0 + $0x70] sm:$0xff]  ;;  %v45_v58 = vld [vmem:[%s659_s0 + $0x78] sm:$0xff] }
  0x1e   :  { %283 = vperm.xlu1 %436, %v269_v27   ;;  %v93_v56 = vld [vmem:[%s660_s1 + $0x70] sm:$0xff]  ;;  %v94_v59 = vld [vmem:[%s660_s1 + $0x78] sm:$0xff]  ;;  %v440_v5 = vld [vmem:[%s662_s3 + $0x8] sm:$0xff]  }
  0x1f   :  { %407 = vxpose.xlu0.b32.cont [7/16] (narrow) %v406_v26, 16  ;;  %v422_v57 = vpack.i.bf16 %v93_v56, %v44_v55  ;;  %v424_v60 = vpack.i.bf16 %v94_v59, %v45_v58  ;;  %v441_v6 = vld [vmem:[%s661_s2 + $0x8] sm:$0xff]   ;;  %s467_s2 = smov [#allocation3]  }
  0x20   :  { %s354_s3 = sshll.u32 %s467_s2, 4  ;;  %s355_s3 = int_to_ptr.vmem [resolvable:$true] %s354_s3 }
  0x21   :  { %s442_s13 = scalar_lea.vmem %s355_s3, 16  ;;  %s446_s14 = scalar_lea.vmem %s355_s3, 32 }
  0x22   :  { %288 = vperm.xlu1 %436, %v270_v31   ;;  %p443_p0 = scmp.ne.s32.totalorder %s355_s3, %s442_s13  ;;  %p447_p1 = scmp.lt.s32.totalorder %s355_s3, %s355_s3 }
  0x23   :  { %409 = vxpose.xlu0.b32.cont [8/16] (narrow) %v408_v30, 16  ;;  %p448_p2 = scmp.lt.s32.totalorder %s446_s14, %s442_s13 }
  0x25   :  { %p449_p3 = por %p448_p2, %p447_p1 }
  0x26   :  { %305 = vperm.xlu1 %436, %v299_v35  }
  0x27   :  { %411 = vxpose.xlu0.b32.cont [9/16] (narrow) %v410_v34, 16  ;;  %p450_p4 = pnand %p449_p3, %p443_p0 }
  0x2a   :  { %310 = vperm.xlu1 %436, %v300_v39  }
  0x2b   :  { %413 = vxpose.xlu0.b32.cont [10/16] (narrow) %v412_v38, 16 }
  0x2e   :  { %315 = vperm.xlu1 %436, %v301_v43  }
  0x2f   :  { %415 = vxpose.xlu0.b32.cont [11/16] (narrow) %v414_v42, 16 }
  0x32   :  { %320 = vperm.xlu1 %436, %v302_v47   ;;  %v344_v47 = vsub.s32 0, %v343_v44 }
  0x33   :  { %417 = vxpose.xlu0.b32.cont [12/16] (narrow) %v416_v46, 16 }
  0x36   :  { %339 = vperm.xlu1 %436, %v336_v51  }
  0x37   :  { %419 = vxpose.xlu0.b32.cont [13/16] (narrow) %v418_v50, 16 }
  0x3b   :  { %421 = vxpose.xlu0.b32.cont [14/16] (narrow) %v420_v54, 16 }
  0x3f   :  { %423 = vxpose.xlu0.b32.cont [15/16] (narrow) %v422_v57, 16 }
  0x43   :  { %425 = vxpose.xlu0.b32.end [16/16] (narrow) %v424_v60, 16 }
  0x6c   :  { %437 = vset.pattern.permute.xlu0 %v466_v21 }
  0x87   :  { %v426_v61 = vpop.trf.xlu0 }
  0x88   :  { %v430_v63 = vunpack.i.h.bf16 %v426_v61  ;;  %v427_v0 = vunpack.i.l.bf16 %v426_v61 }
  0x8b   :  { %v431_v62 = vpop.trf.xlu0 }
  0x8c   :  { %v435_v1 = vunpack.i.h.bf16 %v431_v62  ;;  %v432_v2 = vunpack.i.l.bf16 %v431_v62 }
  0x8e   :  { %v127_v3 = vpack.c.bf16 %v435_v1, %v430_v63  ;;  %v78_v4 = vpack.c.bf16 %v432_v2, %v427_v0 }
  0x90   :  { %376 = vmatprep.subr.bf16.mxu1 %v127_v3  ;;  %382 = vmatprep.subr.bf16.mxu0 %v78_v4 }
  0x91   :  { %377 = vmatpush3.bf16.msra.mxu1 %v127_v3  ;;  %383 = vmatpush3.bf16.msra.mxu0 %v78_v4 }
  0x94   :  { %379 = vmatmul.mubr.msk.bf16.vlgmr.msra.gmra.mrb[0].mxu1 %vm146_vm0, %v440_v5  ;;  %385 = vmatmul.mubr.msk.bf16.vlgmr.msra.gmra.mrb[0].mxu0 %vm146_vm0, %v441_v6 }
  0x95   :  { %v274_v7 = vpop.permute.xlu1 %273 }
  0x99   :  { %v279_v8 = vpop.permute.xlu1 %278 }
  0x9d   :  { %v284_v9 = vpop.permute.xlu1 %283 }
  0xa1   :  { %v289_v10 = vpop.permute.xlu1 %288 }
  0xa5   :  { %v306_v11 = vpop.permute.xlu1 %305 }
  0xa9   :  { %v311_v12 = vpop.permute.xlu1 %310 }
  0xad   :  { %v316_v30 = vpop.permute.xlu1 %315 }
  0xb1   :  { %v321_v38 = vpop.permute.xlu1 %320 }
  0xb5   :  { %v340_v49 = vpop.permute.xlu1 %339 }
  0xb6   :  { %v345_v51 = vrot.slane %v340_v49, %v344_v47 }
 0x167   :  { %v380_v13 = vpop.f32.mrb[0].mxu1  ;;  %v386_v14 = vpop.f32.mrb[0].mxu0 }
 0x168   :  { %v261_v15 = vadd.f32 %v386_v14, %v380_v13  ;;  %v187_v16 = vpop.f32.mrb[1].mxu1  ;;  %v252_v17 = vpop.f32.mrb[1].mxu0 }
 0x169   :  { %v253_v18 = vadd.f32 %v252_v17, %v187_v16  ;;  %v381_v19 = vpop.f32.mrb[2].mxu1  ;;  %v387_v20 = vpop.f32.mrb[2].mxu0 }
 0x16a   :  { %v264_v21 = vadd.f32 %v387_v20, %v381_v19  ;;  %v190_v22 = vpop.f32.mrb[3].mxu1  ;;  %v255_v23 = vpop.f32.mrb[3].mxu0  ;;  %v293_v24 = vadd.f32 %v284_v9, %v261_v15 }
 0x16b   :  { %v291_v25 = vadd.f32 %v274_v7, %v253_v18  ;;  %v256_v26 = vadd.f32 %v255_v23, %v190_v22 }
 0x16c   :  { %v294_v28 = vadd.f32 %v289_v10, %v264_v21  ;;  %v297_v31 = vmax.f32 %v293_v24, 0.0 }
 0x16d   :  { %v295_v27 = vmax.f32 %v291_v25, 0.0  ;;  %v292_v29 = vadd.f32 %v279_v8, %v256_v26 }
 0x16e   :  { %v298_v34 = vmax.f32 %v294_v28, 0.0  ;;  %v325_v36 = vmul.f32 %v316_v30, %v297_v31 }
 0x16f   :  { %v296_v32 = vmax.f32 %v292_v29, 0.0  ;;  %v323_v33 = vmul.f32 %v306_v11, %v295_v27 }
 0x170   :  { %v326_v39 = vmul.f32 %v321_v38, %v298_v34 }
 0x171   :  { %v324_v35 = vmul.f32 %v311_v12, %v296_v32 }
 0x173   :  { %v327_v37 = vadd.f32 %v324_v35, %v323_v33 }
 0x175   :  { %v328_v40 = vadd.f32 %v327_v37, %v325_v36 }
 0x177   :  { %v329_v42 = vadd.f32 %v328_v40, %v326_v39 }
 0x179   :  { %v330_v43 = vrot.slane %v329_v42, 4 }
 0x17b   :  { %v331_v45 = vadd.f32 %v330_v43, %v329_v42 }
 0x17d   :  { %v332_v46 = vrot.slane %v331_v45, 2 }
 0x17f   :  { %v333_v48 = vadd.f32 %v332_v46, %v331_v45 }
 0x181   :  { %v334_v50 = vrot.slane %v333_v48, 1 }
 0x183   :  { %v335_v52 = vadd.f32 %v334_v50, %v333_v48 }
 0x185   :  { %v346_v53 = vadd.f32 %v345_v51, %v335_v52 }
 0x187   :  { %347 = vst [vmem:[#allocation3] sm:$0x1] %v346_v53 }
 0x188   :  { %453 = shalt.err (!%p450_p4)
}
 0x189   :  { %s454_s17 = scalar_lea.hbm %s666_s7, 16 }
 0x18a   :  { %p455_p5 = scmp.ne.s32.totalorder %s666_s7, %s454_s17  ;;  %p458_p6 = scmp.lt.u32.totalorder %s454_s17, %s666_s7 }
 0x18c   :  { %p460_p7 = pnand %p458_p6, %p455_p5 }
 0x18e   :  { %463 = shalt.err (!%p460_p7)
}
 0x18f   :  { %357 = dma.vmem_to_hbm [thread:$0]  %s355_s3, 16, %s666_s7, [#allocation4]  }
 0x190   :  { %464 = dma.done.wait [#allocation4], 16  }
 0x191   :  { %465 = vsyncadd [#allocation4], 4294967280 }
 0x192   :  { %361 = vsyncpa [#allocation4], 1 }

</bundles_post_ra>
